<compile_context>
chip_gen: v6e
topology: v6e:2x2x1
jax: 0.10.0
libtpu: 0.0.40
codegen_flags: <defaults>
</compile_context>

<pallas_src>
import functools

import jax
import jax.numpy as jnp
from jax import lax
from jax.experimental import pallas as pl
from jax.experimental.pallas import tpu as pltpu

_INV_SQRT2 = 0.7071067811865476
_MIB = 1024 * 1024


def _round_up(x, m):
    return (x + m - 1) // m * m


def _gelu_exact_f32(h):
    return 0.5 * h * (1.0 + lax.erf(h * jnp.float32(_INV_SQRT2)))


# ----------------------------------------------------------------------------
# Kernels
# ----------------------------------------------------------------------------
def _ffn_kernel_fused(x_ref, w1_ref, b1_ref, w2_ref, b2_ref, o_ref):
    # Whole hidden dim resident: weights DMA'd once, no accumulator scratch.
    h = jnp.dot(x_ref[...], w1_ref[...], preferred_element_type=jnp.float32)
    h = h + b1_ref[...].astype(jnp.float32)
    h = _gelu_exact_f32(h)
    out = jnp.dot(h.astype(w2_ref.dtype), w2_ref[...],
                  preferred_element_type=jnp.float32)
    o_ref[...] = (out + b2_ref[...].astype(jnp.float32)).astype(o_ref.dtype)


def _ffn_kernel_chunked(x_ref, w1_ref, b1_ref, w2_ref, b2_ref, o_ref, acc_ref):
    # x_ref:  (tm, E)   row tile (resident across the H axis)
    # w1_ref: (E, th)   W1 column chunk          b1_ref: (1, th)
    # w2_ref: (th, E)   W2 row chunk             b2_ref: (1, E)
    # o_ref:  (tm, E)   output row tile          acc_ref: (tm, E) f32 scratch
    k = pl.program_id(1)

    @pl.when(k == 0)
    def _():
        acc_ref[...] = jnp.zeros_like(acc_ref)

    h = jnp.dot(x_ref[...], w1_ref[...], preferred_element_type=jnp.float32)
    h = h + b1_ref[...].astype(jnp.float32)
    h = _gelu_exact_f32(h)
    acc_ref[...] += jnp.dot(h.astype(w2_ref.dtype), w2_ref[...],
                            preferred_element_type=jnp.float32)

    @pl.when(k == pl.num_programs(1) - 1)
    def _():
        o_ref[...] = (acc_ref[...] + b2_ref[...].astype(jnp.float32)
                      ).astype(o_ref.dtype)


# ----------------------------------------------------------------------------
# VMEM budgeting helpers (double-buffered inputs/outputs + live intermediates)
# ----------------------------------------------------------------------------
def _vmem_budget_bytes():
    """Generation-aware scoped-VMEM budget with headroom."""
    cap = 64 * _MIB  # conservative fallback (v7x per-TC physical)
    try:
        info = pltpu.get_tpu_info()
        cap = int(getattr(info, "vmem_capacity_bytes", cap))
    except Exception:
        pass
    budget = min(int(cap * 0.85), cap - 8 * _MIB)
    return max(budget, 32 * _MIB)


def _vmem_need_fused(tm, E, H, isz):
    return (2 * tm * E * isz                       # x tile (double buffered)
            + 2 * (E * H + H * E) * isz            # W1 + W2
            + 2 * (8 * H + 8 * E) * 4              # b1 + b2 (sublane-padded)
            + 2 * tm * E * isz                     # output tile
            + tm * H * (4 + isz))                  # f32 GELU tile + cast copy


def _vmem_need_chunked(tm, th, E, isz):
    return (2 * tm * E * isz                       # x tile
            + 2 * (E * th + th * E) * isz          # W1 / W2 chunks
            + 2 * (8 * th + 8 * E) * 4             # b1 chunk + b2
            + 2 * tm * E * isz                     # output tile
            + tm * E * 4                           # f32 accumulator scratch
            + tm * th * (4 + isz))                 # f32 GELU chunk + cast copy


# ----------------------------------------------------------------------------
# Wrapper
# ----------------------------------------------------------------------------
@functools.partial(jax.jit, static_argnames=("tm", "th", "cast_to_bf16"))
def feed_forward(x, w1, b1, w2, b2, *, tm=512, th=1024, cast_to_bf16=False):
    """x: [B, S, E] -> [B, S, E].  Fused Linear->GELU->Linear (dropout = identity)."""
    B, S, E = x.shape
    H = w1.shape[1]  # 4 * E
    M = B * S

    if cast_to_bf16:
        # MXU runs at full rate on bf16 operands; bias/GELU/accumulation stay f32.
        x = x.astype(jnp.bfloat16)
        w1 = w1.astype(jnp.bfloat16)
        w2 = w2.astype(jnp.bfloat16)

    isz = x.dtype.itemsize
    sub = 8 if isz >= 4 else (16 if isz == 2 else 32)  # sublane packing per dtype
    budget = _vmem_budget_bytes()

    x2d = x.reshape(M, E)

    # ---- Path selection: keep full weights VMEM-resident when they are small.
    weight_bytes = 2 * E * H * isz
    tm_f = min(tm, _round_up(M, sub))
    while tm_f > sub and _vmem_need_fused(tm_f, E, H, isz) > budget:
        tm_f = max(sub, tm_f // 2)
    use_fused = (weight_bytes <= int(0.4 * budget)
                 and _vmem_need_fused(tm_f, E, H, isz) <= budget)

    if use_fused:
        tm_eff = tm_f
        M_pad = _round_up(M, tm_eff)
        if M_pad != M:
            x2d = jnp.pad(x2d, ((0, M_pad - M), (0, 0)))
        b1_2d = b1.reshape(1, H)
        b2_2d = b2.reshape(1, E)

        cost = pl.CostEstimate(
            flops=4 * M * E * H,
            transcendentals=M * H,
            bytes_accessed=(x2d.size + w1.size + b1_2d.size + w2.size
                            + b2_2d.size + M_pad * E) * isz,
        )

        out2d = pl.pallas_call(
            _ffn_kernel_fused,
            out_shape=jax.ShapeDtypeStruct((M_pad, E), x.dtype),
            grid_spec=pltpu.PrefetchScalarGridSpec(
                num_scalar_prefetch=0,
                grid=(M_pad // tm_eff,),
                in_specs=[
                    pl.BlockSpec((tm_eff, E), lambda i: (i, 0)),  # x row tile
                    pl.BlockSpec((E, H), lambda i: (0, 0)),       # W1 (resident)
                    pl.BlockSpec((1, H), lambda i: (0, 0)),       # b1
                    pl.BlockSpec((H, E), lambda i: (0, 0)),       # W2 (resident)
                    pl.BlockSpec((1, E), lambda i: (0, 0)),       # b2
                ],
                out_specs=pl.BlockSpec((tm_eff, E), lambda i: (i, 0)),
            ),
            compiler_params=pltpu.CompilerParams(
                dimension_semantics=("parallel",),   # megacore shards row tiles
                vmem_limit_bytes=int(budget),
            ),
            cost_estimate=cost,
        )(x2d, w1, b1_2d, w2, b2_2d)

    else:
        # ---- Chunked path: stream W1 cols / W2 rows, f32 accumulator scratch.
        tm_eff = min(tm, _round_up(M, sub))
        th_eff = min(th, _round_up(H, 128))
        while _vmem_need_chunked(tm_eff, th_eff, E, isz) > budget:
            if th_eff > 256:
                th_eff //= 2
            elif tm_eff > 2 * sub:
                tm_eff = max(sub, tm_eff // 2)
            else:
                break

        M_pad = _round_up(M, tm_eff)
        H_pad = _round_up(H, th_eff)
        if M_pad != M:
            x2d = jnp.pad(x2d, ((0, M_pad - M), (0, 0)))
        if H_pad != H:
            # Zero-padded W1 cols / b1 / W2 rows contribute exactly 0 (GELU(0)=0).
            w1 = jnp.pad(w1, ((0, 0), (0, H_pad - H)))
            b1 = jnp.pad(b1, ((0, H_pad - H),))
            w2 = jnp.pad(w2, ((0, H_pad - H), (0, 0)))
        b1_2d = b1.reshape(1, H_pad)
        b2_2d = b2.reshape(1, E)

        n_row_tiles = M_pad // tm_eff
        cost = pl.CostEstimate(
            flops=4 * M * E * H,
            transcendentals=M * H,
            bytes_accessed=(x2d.size
                            + n_row_tiles * (w1.size + b1_2d.size + w2.size)
                            + b2_2d.size + M_pad * E) * isz,
        )

        out2d = pl.pallas_call(
            _ffn_kernel_chunked,
            out_shape=jax.ShapeDtypeStruct((M_pad, E), x.dtype),
            grid_spec=pltpu.PrefetchScalarGridSpec(
                num_scalar_prefetch=0,
                grid=(M_pad // tm_eff, H_pad // th_eff),
                in_specs=[
                    pl.BlockSpec((tm_eff, E), lambda i, k: (i, 0)),    # x row tile
                    pl.BlockSpec((E, th_eff), lambda i, k: (0, k)),    # W1 col chunk
                    pl.BlockSpec((1, th_eff), lambda i, k: (0, k)),    # b1 chunk
                    pl.BlockSpec((th_eff, E), lambda i, k: (k, 0)),    # W2 row chunk
                    pl.BlockSpec((1, E), lambda i, k: (0, 0)),         # b2 (full)
                ],
                out_specs=pl.BlockSpec((tm_eff, E), lambda i, k: (i, 0)),
                scratch_shapes=[pltpu.VMEM((tm_eff, E), jnp.float32)],
            ),
            compiler_params=pltpu.CompilerParams(
                dimension_semantics=("parallel", "arbitrary"),
                vmem_limit_bytes=int(budget),
            ),
            cost_estimate=cost,
        )(x2d, w1, b1_2d, w2, b2_2d)

    if M_pad != M:
        out2d = out2d[:M]
    return out2d.reshape(B, S, E).astype(x.dtype)


def _reference(x, w1, b1, w2, b2):
    hp = lax.Precision.HIGHEST
    h = jnp.dot(x, w1, precision=hp) + b1
    h = jax.nn.gelu(h, approximate=False)
    return jnp.dot(h, w2, precision=hp) + b2


if __name__ == "__main__":
    # CONFIG-implied small shapes: emb_dim=32, hidden=4*emb=128, batch=2, seq=8
    B, S, E = 2, 8, 32
    H = 4 * E

    key = jax.random.PRNGKey(0)
    kx, k1, k2, k3, k4 = jax.random.split(key, 5)

    x = jax.random.normal(kx, (B, S, E), dtype=jnp.float32)

    # Deterministic parameter init (uniform, roughly matching nn.Linear scale)
    lim1 = 1.0 / jnp.sqrt(E)
    lim2 = 1.0 / jnp.sqrt(H)
    w1 = jax.random.uniform(k1, (E, H), jnp.float32, -lim1, lim1)
    b1 = jax.random.uniform(k2, (H,), jnp.float32, -lim1, lim1)
    w2 = jax.random.uniform(k3, (H, E), jnp.float32, -lim2, lim2)
    b2 = jax.random.uniform(k4, (E,), jnp.float32, -lim2, lim2)

    out = feed_forward(x, w1, b1, w2, b2)
    out = jax.block_until_ready(out)

    ref = _reference(x, w1, b1, w2, b2)
    assert out.shape == (B, S, E)
    assert jnp.allclose(out, ref, atol=1e-3, rtol=1e-3), "mismatch vs reference"

    print("KERNEL_OK")
</pallas_src>

<mosaic_0001>
module attributes {stable_mosaic.version = 11 : i64} {
  func.func @_ffn_kernel_fused(%arg0: i32, %arg1: memref<16x32xf32, #tpu.memory_space<vmem>>, %arg2: memref<32x128xf32, #tpu.memory_space<vmem>>, %arg3: memref<1x128xf32, #tpu.memory_space<vmem>>, %arg4: memref<128x32xf32, #tpu.memory_space<vmem>>, %arg5: memref<1x32xf32, #tpu.memory_space<vmem>>, %arg6: memref<16x32xf32, #tpu.memory_space<vmem>>) attributes {dimension_semantics = [#tpu.dimension_semantics<parallel>], iteration_bounds = array<i64: 1>, scalar_prefetch = 0 : i64, scratch_operands = 0 : i64, tpu.core_type = #tpu.core_type<tc>, window_params = [{transform_indices = @transform_0, window_bounds = array<i64: 16, 32>}, {pipeline_mode = #tpu.pipeline_mode<synchronous>, transform_indices = @transform_1, window_bounds = array<i64: 32, 128>}, {pipeline_mode = #tpu.pipeline_mode<synchronous>, transform_indices = @transform_2, window_bounds = array<i64: 1, 128>}, {pipeline_mode = #tpu.pipeline_mode<synchronous>, transform_indices = @transform_3, window_bounds = array<i64: 128, 32>}, {pipeline_mode = #tpu.pipeline_mode<synchronous>, transform_indices = @transform_4, window_bounds = array<i64: 1, 32>}, {transform_indices = @transform_5, window_bounds = array<i64: 16, 32>}]} {
    %c0 = arith.constant 0 : index
    %c0_0 = arith.constant 0 : index
    %0 = vector.load %arg1[%c0, %c0_0] : memref<16x32xf32, #tpu.memory_space<vmem>>, vector<16x32xf32>
    %c0_1 = arith.constant 0 : index
    %c0_2 = arith.constant 0 : index
    %1 = vector.load %arg2[%c0_1, %c0_2] : memref<32x128xf32, #tpu.memory_space<vmem>>, vector<32x128xf32>
    %cst = arith.constant dense<0.000000e+00> : vector<16x128xf32>
    %2 = tpu.matmul %0, %1, %cst {dimension_numbers = #tpu.dot_dimension_numbers<[1], [0], [0], [1], [0, 0, 1, 1], [], []>} : vector<16x32xf32>, vector<32x128xf32>, vector<16x128xf32> -> vector<16x128xf32>
    %c0_3 = arith.constant 0 : index
    %c0_4 = arith.constant 0 : index
    %3 = vector.load %arg3[%c0_3, %c0_4] : memref<1x128xf32, #tpu.memory_space<vmem>>, vector<1x128xf32>
    %4 = vector.broadcast %3 : vector<1x128xf32> to vector<16x128xf32>
    %5 = arith.addf %2, %4 : vector<16x128xf32>
    %cst_5 = arith.constant 5.000000e-01 : f32
    %6 = vector.broadcast %cst_5 : f32 to vector<16x128xf32>
    %7 = arith.mulf %6, %5 : vector<16x128xf32>
    %cst_6 = arith.constant 0.707106769 : f32
    %8 = vector.broadcast %cst_6 : f32 to vector<16x128xf32>
    %9 = arith.mulf %5, %8 : vector<16x128xf32>
    %10 = math.erf %9 : vector<16x128xf32>
    %cst_7 = arith.constant 1.000000e+00 : f32
    %11 = vector.broadcast %cst_7 : f32 to vector<16x128xf32>
    %12 = arith.addf %11, %10 : vector<16x128xf32>
    %13 = arith.mulf %7, %12 : vector<16x128xf32>
    %c0_8 = arith.constant 0 : index
    %c0_9 = arith.constant 0 : index
    %14 = vector.load %arg4[%c0_8, %c0_9] : memref<128x32xf32, #tpu.memory_space<vmem>>, vector<128x32xf32>
    %cst_10 = arith.constant dense<0.000000e+00> : vector<16x32xf32>
    %15 = tpu.matmul %13, %14, %cst_10 {dimension_numbers = #tpu.dot_dimension_numbers<[1], [0], [0], [1], [0, 0, 1, 1], [], []>} : vector<16x128xf32>, vector<128x32xf32>, vector<16x32xf32> -> vector<16x32xf32>
    %c0_11 = arith.constant 0 : index
    %c0_12 = arith.constant 0 : index
    %16 = vector.load %arg5[%c0_11, %c0_12] : memref<1x32xf32, #tpu.memory_space<vmem>>, vector<1x32xf32>
    %17 = vector.broadcast %16 : vector<1x32xf32> to vector<16x32xf32>
    %18 = arith.addf %15, %17 : vector<16x32xf32>
    %c0_13 = arith.constant 0 : index
    %c0_14 = arith.constant 0 : index
    %19 = vector.load %arg6[%c0_13, %c0_14] : memref<16x32xf32, #tpu.memory_space<vmem>>, vector<16x32xf32>
    tpu.vector_store %arg6[%c0_13, %c0_14], %18 {strides = array<i32>} : memref<16x32xf32, #tpu.memory_space<vmem>>, vector<16x32xf32>,
    return
  }
  func.func @transform_0(%arg0: i32) -> (i32, i32) {
    %c0_i32 = arith.constant 0 : i32
    %c0_i32_0 = arith.constant 0 : i32
    return %arg0, %c0_i32 : i32, i32
  }
  func.func @transform_1(%arg0: i32) -> (i32, i32) {
    %c0_i32 = arith.constant 0 : i32
    %c0_i32_0 = arith.constant 0 : i32
    %c0_i32_1 = arith.constant 0 : i32
    return %c0_i32, %c0_i32_0 : i32, i32
  }
  func.func @transform_2(%arg0: i32) -> (i32, i32) {
    %c0_i32 = arith.constant 0 : i32
    %c0_i32_0 = arith.constant 0 : i32
    %c0_i32_1 = arith.constant 0 : i32
    return %c0_i32, %c0_i32_0 : i32, i32
  }
  func.func @transform_3(%arg0: i32) -> (i32, i32) {
    %c0_i32 = arith.constant 0 : i32
    %c0_i32_0 = arith.constant 0 : i32
    %c0_i32_1 = arith.constant 0 : i32
    return %c0_i32, %c0_i32_0 : i32, i32
  }
  func.func @transform_4(%arg0: i32) -> (i32, i32) {
    %c0_i32 = arith.constant 0 : i32
    %c0_i32_0 = arith.constant 0 : i32
    %c0_i32_1 = arith.constant 0 : i32
    return %c0_i32, %c0_i32_0 : i32, i32
  }
  func.func @transform_5(%arg0: i32) -> (i32, i32) {
    %c0_i32 = arith.constant 0 : i32
    %c0_i32_0 = arith.constant 0 : i32
    return %arg0, %c0_i32 : i32, i32
  }
}

</mosaic_0001>

<bundles_post_ra>
// kernel: feed_forward.1
= control target key start
LH: loop header
LB: loop body
LE: loop exit
PB: predicated region body
PF: predicated region fallthrough
CT: control target
= control target key end

     0   :  { %vm34_vm0 = vcmask 261120   ;;  %s457_s0 = inlined_call_operand.vmem [shape: f32[16,32], index: 0, kind: input, shape index: {}]   ;;  %s458_s1 = inlined_call_operand.vmem [shape: f32[32,128], index: 1, kind: input, shape index: {}]   ;;  %s459_s2 = inlined_call_operand.vmem [shape: f32[1,128], index: 2, kind: input, shape index: {}]   ;;  %s460_s3 = inlined_call_operand.vmem [shape: f32[128,32], index: 3, kind: input, shape index: {}]   ;;  %s461_s4 = inlined_call_operand.vmem [shape: f32[1,32], index: 4, kind: input, shape index: {}]   ;;  %s462_s5 = inlined_call_operand.hbm [shape: f32[16,32], index: 5, kind: output, shape index: {}]  }
   0x1   :  { %v26_v0 = vld [vmem:[%s458_s1 + $0x18] sm:$0xff]  ;;  %v25_v1 = vld [vmem:[%s458_s1 + $0x10] sm:$0xff]  ;;  %v21_v2 = vld [vmem:[%s457_s0] sm:$0xff] }
   0x2   :  { %270 = vmatprep.subr.mxu0 %v26_v0  ;;  %v24_v3 = vld [vmem:[%s458_s1 + $0x8] sm:$0xff]  ;;  %278 = vmatprep.mubr.msk.f32.mxu0 %vm34_vm0, %v21_v2  ;;  %v141_v4 = vld [vmem:[%s460_s3 + $0x78] sm:$0xff]  ;;  %v140_v5 = vld [vmem:[%s460_s3 + $0x70] sm:$0xff] }
   0x3   :  { %271 = vmatpush3.msra.mxu0 %v26_v0  ;;  %281 = vmatprep.subr.mxu1 %v141_v4 }
   0x4   :  { %272 = vmatprep.subr.mxu0 %v25_v1 }
   0x5   :  { %10 = vsyncpa [#allocation3], 0  ;;  %273 = vmatpush3.msra.mxu0 %v25_v1  ;;  %v23_v6 = vld [vmem:[%s458_s1] sm:$0xff]  ;;  %282 = vmatpush3.msra.mxu1 %v141_v4  ;;  %v139_v7 = vld [vmem:[%s460_s3 + $0x68] sm:$0xff]  ;;  %s345_s11 = smov [#allocation2]  }
   0x6   :  { %274 = vmatprep.subr.mxu0 %v24_v3  ;;  %283 = vmatprep.subr.mxu1 %v140_v5  ;;  %v22_v8 = vld [vmem:[%s457_s0 + $0x8] sm:$0xff]  ;;  %v138_v9 = vld [vmem:[%s460_s3 + $0x60] sm:$0xff]  ;;  %v137_v10 = vld [vmem:[%s460_s3 + $0x58] sm:$0xff]  ;;  %s231_s12 = sshll.u32 %s345_s11, 4  ;;  %s232_s12 = int_to_ptr.vmem [resolvable:$true] %s231_s12 }
   0x7   :  { %275 = vmatpush3.msra.mxu0 %v24_v3  ;;  %284 = vmatpush3.msra.mxu1 %v140_v5  ;;  %v136_v11 = vld [vmem:[%s460_s3 + $0x50] sm:$0xff]  ;;  %v135_v12 = vld [vmem:[%s460_s3 + $0x48] sm:$0xff]  ;;  %v134_v13 = vld [vmem:[%s460_s3 + $0x40] sm:$0xff]  ;;  %s323_s13 = scalar_lea.vmem %s232_s12, 256  ;;  %p328_p1 = scmp.lt.s32.totalorder %s232_s12, %s232_s12 }
   0x8   :  { %276 = vmatprep.subr.mxu0 %v23_v6  ;;  %285 = vmatprep.subr.mxu1 %v139_v7  ;;  %v133_v14 = vld [vmem:[%s460_s3 + $0x38] sm:$0xff]  ;;  %v132_v15 = vld [vmem:[%s460_s3 + $0x30] sm:$0xff]  ;;  %v131_v16 = vld [vmem:[%s460_s3 + $0x28] sm:$0xff]  ;;  %p324_p0 = scmp.ne.s32.totalorder %s232_s12, %s323_s13  ;;  %p329_p2 = scmp.lt.s32.totalorder %s323_s13, %s323_s13 }
   0x9   :  { %277 = vmatpush3.msra.mxu0 %v23_v6  ;;  %286 = vmatpush3.msra.mxu1 %v139_v7  ;;  %v130_v17 = vld [vmem:[%s460_s3 + $0x20] sm:$0xff]  ;;  %v129_v18 = vld [vmem:[%s460_s3 + $0x18] sm:$0xff]  ;;  %v128_v19 = vld [vmem:[%s460_s3 + $0x10] sm:$0xff] }
   0xa   :  { %279 = vmatmul.mubr.msk.f32.vlgmr.msra.gmra.mxu0 %vm34_vm0, %v22_v8  ;;  %287 = vmatprep.subr.mxu1 %v138_v9  ;;  %v127_v20 = vld [vmem:[%s460_s3 + $0x8] sm:$0xff]  ;;  %v126_v21 = vld [vmem:[%s460_s3] sm:$0xff]  ;;  %p330_p3 = por %p329_p2, %p328_p1 }
   0xb   :  { %288 = vmatpush3.msra.mxu1 %v138_v9  ;;  %v242_v22 = vld [vmem:[%s459_s2] ss:$0 sm:$0xff] }
   0xc   :  { %289 = vmatprep.subr.mxu1 %v137_v10  ;;  %v245_v37 = vld [vmem:[%s461_s4] ss:$0 sm:$0xff]  ;;  %p331_p4 = pnand %p330_p3, %p324_p0 }
   0xd   :  { %290 = vmatpush3.msra.mxu1 %v137_v10 }
   0xe   :  { %291 = vmatprep.subr.mxu1 %v136_v11 }
   0xf   :  { %292 = vmatpush3.msra.mxu1 %v136_v11 }
  0x10   :  { %293 = vmatprep.subr.mxu1 %v135_v12 }
  0x11   :  { %294 = vmatpush3.msra.mxu1 %v135_v12 }
  0x12   :  { %295 = vmatprep.subr.mxu1 %v134_v13 }
  0x13   :  { %296 = vmatpush3.msra.mxu1 %v134_v13 }
  0x14   :  { %297 = vmatprep.subr.mxu1 %v133_v14 }
  0x15   :  { %298 = vmatpush3.msra.mxu1 %v133_v14 }
  0x16   :  { %299 = vmatprep.subr.mxu1 %v132_v15 }
  0x17   :  { %300 = vmatpush3.msra.mxu1 %v132_v15 }
  0x18   :  { %301 = vmatprep.subr.mxu1 %v131_v16 }
  0x19   :  { %302 = vmatpush3.msra.mxu1 %v131_v16 }
  0x1a   :  { %303 = vmatprep.subr.mxu1 %v130_v17 }
  0x1b   :  { %304 = vmatpush3.msra.mxu1 %v130_v17 }
  0x1c   :  { %305 = vmatprep.subr.mxu1 %v129_v18 }
  0x1d   :  { %306 = vmatpush3.msra.mxu1 %v129_v18 }
  0x1e   :  { %307 = vmatprep.subr.mxu1 %v128_v19 }
  0x1f   :  { %308 = vmatpush3.msra.mxu1 %v128_v19 }
  0x20   :  { %309 = vmatprep.subr.mxu1 %v127_v20 }
  0x21   :  { %310 = vmatpush3.msra.mxu1 %v127_v20 }
  0x22   :  { %311 = vmatprep.subr.mxu1 %v126_v21 }
  0x23   :  { %312 = vmatpush3.msra.mxu1 %v126_v21 }
  0xca   :  { %v280_v23 = vpop.f32.mrf.mxu0 }
  0xcb   :  { %v113_v24 = vadd.f32 %v280_v23, %v242_v22 }
  0xcc   :  { %v107_v25 = vpop.f32.mrf.mxu0 }
  0xcd   :  { %v119_v26 = vmul.f32 0.70710677, %v113_v24  ;;  %v108_v27 = vadd.f32 %v242_v22, %v107_v25  ;;  %v117_v34 = vmul.f32 0.5, %v113_v24 }
  0xcf   :  { %319 = verf.f32 %v119_v26  ;;  %v118_v28 = vmul.f32 0.70710677, %v108_v27  ;;  %v116_v32 = vmul.f32 0.5, %v108_v27 }
  0xd1   :  { %321 = verf.f32 %v118_v28 }
  0xdc   :  { %v320_v29 = vpop.eup %319 }
  0xdd   :  { %v123_v31 = vadd.f32 1.0, %v320_v29 }
  0xde   :  { %v322_v30 = vpop.eup %321 }
  0xdf   :  { %v122_v33 = vadd.f32 1.0, %v322_v30  ;;  %v125_v36 = vmul.f32 %v123_v31, %v117_v34 }
  0xe1   :  { %v124_v35 = vmul.f32 %v122_v33, %v116_v32 }
  0xe3   :  { %313 = vmatprep.mubr.f32.mxu1 %v124_v35 }
  0xe4   :  { %314 = vmatmul.mubr.f32.vlgmr.msra.gmra.mxu1 %v125_v36 }
 0x1a4   :  { %v315_v38 = vpop.f32.mrf.mxu1 }
 0x1a5   :  { %v221_v39 = vadd.f32 %v315_v38, %v245_v37 }
 0x1a6   :  { %v215_v40 = vpop.f32.mrf.mxu1 }
 0x1a7   :  { %225 = vst.msk [vmem:[#allocation2 + $0x8] sm:$0xff] %vm34_vm0, %v221_v39  ;;  %v216_v41 = vadd.f32 %v245_v37, %v215_v40 }
 0x1a9   :  { %224 = vst.msk [vmem:[#allocation2] sm:$0xff] %vm34_vm0, %v216_v41 }
 0x1aa   :  { %334 = shalt.err (!%p331_p4)
}
 0x1ab   :  { %s346_s0 = smov 128   ;;  %s347_s4 = smov 8  }
 0x1ac   :  { %237 = dma.vmem_to_hbm [thread:$0]  %s232_s12, 256, %s462_s5, [#allocation3], %s346_s0, %s346_s0, %s347_s4  }
 0x1ad   :  { %343 = dma.done.wait [#allocation3], 256  }
 0x1ae   :  { %344 = vsyncadd [#allocation3], 4294967040 }
 0x1af   :  { %241 = vsyncpa [#allocation3], 1 }

</bundles_post_ra>
